<compile_context>
chip_gen: v5e
topology: v5e:2x2
jax: 0.10.0
libtpu: 0.0.40
codegen_flags: <defaults>
</compile_context>

<pallas_src>
import jax
import jax.numpy as jnp
from jax.experimental import pallas as pl
from jax.experimental.pallas import tpu as pltpu

_LANES = 128
_PAIR = 2 * _LANES               # 256: one row of 128 interleaved (cos, sin) biternions
_MAX_BLOCK_ROWS = 1024           # (1024, 256) f32 tile = 1 MiB -> ~5 MiB VMEM w/ dbl-buffer
_MIN_SPLIT_ROWS = 512            # floor for large batches (>= 85% of HBM roofline)
_MIN_PALLAS_BATCH = 128          # below one lane-tile, a pallas_call costs more than the op


def _round_up(x, m):
    return (x + m - 1) // m * m


def _choose_block_rows(rows, requested=None):
    """Pick block_rows: multiple of 8, <= 1024, low padding waste, >=2 steps when big."""
    if requested is not None:
        br = max(8, min(_MAX_BLOCK_ROWS, _round_up(int(requested), 8)))
        return min(br, _round_up(rows, 8))          # never pad past one whole batch
    if rows < 2 * _MIN_SPLIT_ROWS:
        # Small/medium batch: one (or a couple of) blocks, tail pad <= 7 rows.
        return min(_MAX_BLOCK_ROWS, _round_up(rows, 8))
    # Large batch: guarantee >= 2 grid steps (v7x megacore) with blocks in [512, 1024]
    # and keep padded rows under ~10% of the batch.
    br = min(_MAX_BLOCK_ROWS, _round_up(pl.cdiv(rows, 2), 8))
    while br > _MIN_SPLIT_ROWS and (_round_up(rows, br) - rows) * 10 > rows:
        br = max(_MIN_SPLIT_ROWS, _round_up(br // 2, 8))
    return br


def _vonmises_kernel(kappa_ref, psum_ref, pred_ref, targ_ref, out_ref):
    """pred/targ: (R, 256) interleaved biternions (native dtype); psum: (256, 128) f32;
    out: (R, 128) f32."""
    kappa = kappa_ref[0]                                         # scalar from SMEM
    # Cast in vregs (no wrapper-side HBM cast pass); elementwise product on the VPU.
    prod = pred_ref[...].astype(jnp.float32) * targ_ref[...].astype(jnp.float32)
    # Pair-sum on the otherwise-idle MXU: cos[r, k] = prod[r, 2k] + prod[r, 2k+1].
    cos_angles = jnp.dot(prod, psum_ref[...], preferred_element_type=jnp.float32)
    # exp goes to the EUP (free slot); everything stays lane-dense (R, 128).
    out_ref[...] = 1.0 - jnp.exp(kappa * (cos_angles - 1.0))


def _vonmises_ref(prediction, target, kappa):
    cos = jnp.sum(prediction.astype(jnp.float32) * target.astype(jnp.float32), axis=-1)
    return 1.0 - jnp.exp(jnp.float32(kappa) * (cos - 1.0))


def vonmises_loss_biternion(prediction, target, kappa, *, block_rows=None):
    """prediction, target: (B, 2) biternions (any float dtype).  Returns (B,) float32."""
    assert prediction.shape == target.shape
    B, D = prediction.shape
    assert D == 2, "biternion inputs must have 2 components"

    if B < _MIN_PALLAS_BATCH:
        # Tiny batch: XLA fuses this into one trivial kernel; skip custom-call overhead.
        return _vonmises_ref(prediction, target, kappa)

    rows = pl.cdiv(B, _LANES)
    br = _choose_block_rows(rows, block_rows)
    rows_pad = _round_up(rows, br)
    flat_len = rows_pad * _PAIR

    def to_rows(x):
        # Row-major (B, 2) -> (rows_pad, 256) is a pure metadata reshape when the
        # batch is already block-aligned; otherwise a single tail-pad pass.
        if 2 * B == flat_len:
            return x.reshape(rows_pad, _PAIR)
        flat = jnp.pad(x.reshape(-1), (0, flat_len - 2 * B))
        return flat.reshape(rows_pad, _PAIR)

    pred_r = to_rows(prediction)
    targ_r = to_rows(target)
    kappa_arr = jnp.full((1,), kappa, dtype=jnp.float32)
    # Constant pair-sum matrix S: S[2k, k] = S[2k+1, k] = 1 (loaded into VMEM once —
    # its block index never changes across the grid).
    psum = jnp.repeat(jnp.eye(_LANES, dtype=jnp.float32), 2, axis=0)     # (256, 128)

    grid = (rows_pad // br,)
    out = pl.pallas_call(
        _vonmises_kernel,
        out_shape=jax.ShapeDtypeStruct((rows_pad, _LANES), jnp.float32),
        grid=grid,
        in_specs=[
            pl.BlockSpec(memory_space=pltpu.MemorySpace.SMEM),        # kappa scalar
            pl.BlockSpec((_PAIR, _LANES), lambda i: (0, 0)),          # pair-sum const
            pl.BlockSpec((br, _PAIR), lambda i: (i, 0)),              # prediction rows
            pl.BlockSpec((br, _PAIR), lambda i: (i, 0)),              # target rows
        ],
        out_specs=pl.BlockSpec((br, _LANES), lambda i: (i, 0)),
        compiler_params=pltpu.CompilerParams(
            dimension_semantics=("parallel",)),
    )(kappa_arr, psum, pred_r, targ_r)

    # Lane-dense slab -> (B,).  Padded tail rows evaluate to 1 - exp(-kappa) and are
    # trimmed here; if a caller wants to fuse a downstream reduction, return the
    # padded slab plus B instead and mask there.
    return out.reshape(-1)[:B]


if __name__ == "__main__":
    key = jax.random.PRNGKey(0)
    kappa = 1.0  # module hyperparameter

    def make_biternions(k, n, dtype=jnp.float32):
        ang = jax.random.uniform(k, (n,), minval=-jnp.pi, maxval=jnp.pi)
        return jnp.stack([jnp.cos(ang), jnp.sin(ang)], axis=-1).astype(dtype)

    keys = jax.random.split(key, 8)

    # 1) Multi-step grid + tail padding (B=3000 -> rows=24, block_rows=8 -> 3 steps).
    p, t = make_biternions(keys[0], 3000), make_biternions(keys[1], 3000)
    out = jax.block_until_ready(vonmises_loss_biternion(p, t, kappa, block_rows=8))
    ref = _vonmises_ref(p, t, kappa)
    assert out.shape == (3000,), out.shape
    assert jnp.allclose(out, ref, atol=1e-5, rtol=1e-5)

    # 2) Default adaptive tiling (B=640 -> rows=5 -> one 8-row block, padded tail).
    p, t = make_biternions(keys[2], 640), make_biternions(keys[3], 640)
    out = jax.block_until_ready(vonmises_loss_biternion(p, t, kappa))
    ref = _vonmises_ref(p, t, kappa)
    assert out.shape == (640,), out.shape
    assert jnp.allclose(out, ref, atol=1e-5, rtol=1e-5)

    # 3) Native-dtype streaming: bf16 inputs, cast to f32 inside the kernel.
    p = make_biternions(keys[4], 512, jnp.bfloat16)
    t = make_biternions(keys[5], 512, jnp.bfloat16)
    out = jax.block_until_ready(vonmises_loss_biternion(p, t, kappa))
    ref = _vonmises_ref(p, t, kappa)
    assert out.shape == (512,), out.shape
    assert jnp.allclose(out, ref, atol=3e-2)

    # 4) Tiny-batch XLA fallback path.
    p, t = make_biternions(keys[6], 8), make_biternions(keys[7], 8)
    out = jax.block_until_ready(vonmises_loss_biternion(p, t, kappa))
    ref = _vonmises_ref(p, t, kappa)
    assert out.shape == (8,), out.shape
    assert jnp.allclose(out, ref, atol=1e-5, rtol=1e-5)

    print("KERNEL_OK")
</pallas_src>

<mosaic_0001>
module attributes {stable_mosaic.version = 11 : i64} {
  func.func @_vonmises_kernel(%arg0: i32, %arg1: memref<1xf32, #tpu.memory_space<smem>>, %arg2: memref<256x128xf32, #tpu.memory_space<vmem>>, %arg3: memref<8x256xf32, #tpu.memory_space<vmem>>, %arg4: memref<8x256xf32, #tpu.memory_space<vmem>>, %arg5: memref<8x128xf32, #tpu.memory_space<vmem>>) attributes {dimension_semantics = [#tpu.dimension_semantics<parallel>], iteration_bounds = array<i64: 3>, scalar_prefetch = 0 : i64, scratch_operands = 0 : i64, tpu.core_type = #tpu.core_type<tc>, window_params = [{transform_indices = @transform_0, window_bounds = array<i64: 1>}, {pipeline_mode = #tpu.pipeline_mode<synchronous>, transform_indices = @transform_1, window_bounds = array<i64: 256, 128>}, {transform_indices = @transform_2, window_bounds = array<i64: 8, 256>}, {transform_indices = @transform_3, window_bounds = array<i64: 8, 256>}, {transform_indices = @transform_4, window_bounds = array<i64: 8, 128>}]} {
    %c0 = arith.constant 0 : index
    %0 = memref.load %arg1[%c0] : memref<1xf32, #tpu.memory_space<smem>>
    %c0_0 = arith.constant 0 : index
    %c0_1 = arith.constant 0 : index
    %1 = vector.load %arg3[%c0_0, %c0_1] : memref<8x256xf32, #tpu.memory_space<vmem>>, vector<8x256xf32>
    %c0_2 = arith.constant 0 : index
    %c0_3 = arith.constant 0 : index
    %2 = vector.load %arg4[%c0_2, %c0_3] : memref<8x256xf32, #tpu.memory_space<vmem>>, vector<8x256xf32>
    %3 = arith.mulf %1, %2 : vector<8x256xf32>
    %c0_4 = arith.constant 0 : index
    %c0_5 = arith.constant 0 : index
    %4 = vector.load %arg2[%c0_4, %c0_5] : memref<256x128xf32, #tpu.memory_space<vmem>>, vector<256x128xf32>
    %cst = arith.constant dense<0.000000e+00> : vector<8x128xf32>
    %5 = tpu.matmul %3, %4, %cst {dimension_numbers = #tpu.dot_dimension_numbers<[1], [0], [0], [1], [0, 0, 1, 1], [], []>} : vector<8x256xf32>, vector<256x128xf32>, vector<8x128xf32> -> vector<8x128xf32>
    %cst_6 = arith.constant 1.000000e+00 : f32
    %6 = vector.broadcast %cst_6 : f32 to vector<8x128xf32>
    %7 = arith.subf %5, %6 : vector<8x128xf32>
    %8 = vector.broadcast %0 : f32 to vector<8x128xf32>
    %9 = arith.mulf %8, %7 : vector<8x128xf32>
    %10 = math.exp %9 : vector<8x128xf32>
    %cst_7 = arith.constant 1.000000e+00 : f32
    %11 = vector.broadcast %cst_7 : f32 to vector<8x128xf32>
    %12 = arith.subf %11, %10 : vector<8x128xf32>
    %c0_8 = arith.constant 0 : index
    %c0_9 = arith.constant 0 : index
    %13 = vector.load %arg5[%c0_8, %c0_9] : memref<8x128xf32, #tpu.memory_space<vmem>>, vector<8x128xf32>
    tpu.vector_store %arg5[%c0_8, %c0_9], %12 {strides = array<i32>} : memref<8x128xf32, #tpu.memory_space<vmem>>, vector<8x128xf32>,
    return
  }
  func.func @transform_0(%arg0: i32) -> i32 {
    %c0_i32 = arith.constant 0 : i32
    %c0_i32_0 = arith.constant 0 : i32
    return %c0_i32 : i32
  }
  func.func @transform_1(%arg0: i32) -> (i32, i32) {
    %c0_i32 = arith.constant 0 : i32
    %c0_i32_0 = arith.constant 0 : i32
    %c0_i32_1 = arith.constant 0 : i32
    return %c0_i32, %c0_i32_0 : i32, i32
  }
  func.func @transform_2(%arg0: i32) -> (i32, i32) {
    %c0_i32 = arith.constant 0 : i32
    %c0_i32_0 = arith.constant 0 : i32
    return %arg0, %c0_i32 : i32, i32
  }
  func.func @transform_3(%arg0: i32) -> (i32, i32) {
    %c0_i32 = arith.constant 0 : i32
    %c0_i32_0 = arith.constant 0 : i32
    return %arg0, %c0_i32 : i32, i32
  }
  func.func @transform_4(%arg0: i32) -> (i32, i32) {
    %c0_i32 = arith.constant 0 : i32
    %c0_i32_0 = arith.constant 0 : i32
    return %arg0, %c0_i32 : i32, i32
  }
}

</mosaic_0001>

<bundles_post_ra>
// kernel: tpu_custom_call.1
= control target key start
LH: loop header
LB: loop body
LE: loop exit
PB: predicated region body
PF: predicated region fallthrough
CT: control target
= control target key end

     0   :  { %s939_s0 = inlined_call_operand.<no memory space> [shape: f32[1], index: 0, kind: input, shape index: {}]   ;;  %s940_s1 = inlined_call_operand.hbm [shape: f32[256,128], index: 1, kind: input, shape index: {}]   ;;  %s941_s2 = inlined_call_operand.hbm [shape: f32[24,256], index: 2, kind: input, shape index: {}]   ;;  %s942_s3 = inlined_call_operand.hbm [shape: f32[24,256], index: 3, kind: input, shape index: {}]   ;;  %s943_s4 = inlined_call_operand.hbm [shape: f32[24,128], index: 4, kind: output, shape index: {}]  }
   0x1   :  { %945 = sst [smem:[#allocation13_spill]] %s940_s1 }
   0x2   :  { %9 = sst [smem:[#allocation2]] %s939_s0 }
   0x3   :  { %10 = vsyncpa [#allocation4], 0 }
   0x4   :  { %11 = vsyncpa [#allocation7], 0 }
   0x5   :  { %13 = vsyncpa [#allocation7 + $0x1], 0 }
   0x6   :  { %14 = vsyncpa [#allocation5], 0 }
   0x7   :  { %16 = vsyncpa [#allocation5 + $0x1], 0  ;;  %s756_s17 = smov 0   ;;  %s758_s18 = smov 0  }
   0x8   :  { %s760_s19 = smov 0   ;;  %s762_s20 = smov 0  }
   0x9 LB: > { %s777_s0 = sadd.s32 4294967295, %s723_s20   ;;  %s475_s21 = sadd.s32 4294967294, %s723_s20   ;;  %s723_s20 = sphi %s762_s20, %s958_s20   ;;  %s719_s19 = sphi %s760_s19, %s957_s19   ;;  %s715_s18 = sphi %s758_s18, %s956_s18   ;;  %s711_s17 = sphi %s756_s17, %s955_s17  }
   0xa   : > { %s781_s22 = sadd.s32 1, %s723_s20   ;;  %s71_s23 = sadd.s32 1, %s719_s19 }
   0xb   : > { %s68_s24 = ssub.s32 %s723_s20, %s781_s22  ;;  %p78_p0 = scmp.ne.s32.totalorder %s719_s19, %s715_s18 }
   0xc   : > { %p69_p1 = scmp.eq.s32.totalorder %s68_s24, 0  ;;  %p79_p2 = scmp.eq.s32.totalorder %s723_s20, 0 }
   0xd   : > { %p84_p3 = scmp.ne.s32.totalorder %s715_s18, %s711_s17  ;;  %p134_p4 = scmp.eq.s32.totalorder %s777_s0, 2 }
   0xe   : > { %s793_s25 = scalar_select %p69_p1, %s719_s19, %s71_s23  }
   0xf   : > { %p795_p5 = por %p134_p4, %p78_p0  ;;  %p140_p6 = scmp.eq.s32.totalorder %s475_s21, 2 }
  0x10   : > { %p799_p7 = por %p79_p2, %p78_p0  ;;  %p523_p9 = scmp.lt.s32.totalorder %s723_s20, 3 }
  0x11   : > { %p806_p8 = por %p140_p6, %p84_p3  ;;  %s177_s29 = sand.u32 1, %s723_s20  }
  0x12   : > { %s179_s30 = sand.u32 1, %s719_s19   ;;  %s495_s6 = sshll.u32 %s723_s20, 4 }
  0x13   : > { %s813_s5 = sshll.u32 %s179_s30, 4  ;;  %s186_s9 = scalar_lea.hbm %s941_s2, %s495_s6 }
  0x14   : > { %s188_s10 = sshll.u32 %s186_s9, 4  ;;  %s181_s11 = scalar_lea.vmem [#allocation6], %s813_s5  ;;  %s189_s10 = int_to_ptr.hbm [resolvable:$true] %s188_s10 }
  0x15   : > { %s190_s12 = sshll.u32 %s181_s11, 4  ;;  %p822_p10 = pnand %p523_p9, %p799_p7  ;;  %s191_s12 = int_to_ptr.vmem [resolvable:$true] %s190_s12 }
  0x16   : > { %p944_p11 = scmp.eq.s32.totalorder %s777_s0, 0  ;;  %p476_p12 = scmp.ge.s32.totalorder %s723_s20, 1 }
  0x17   : > { %s828_s14 = scalar_lea.sflag [#allocation7], %s177_s29  ;;  %s563_s15 = sshra.s32 %s189_s10, 4  ;;  %s564_s15 = int_to_ptr.hbm [resolvable:$true] %s563_s15 }
  0x18   : > { %s565_s16 = scalar_lea.hbm %s564_s15, 16  ;;  %p567_p0 = pneg %p822_p10 }
  0x19   : > { %p566_p13 = scmp.ne.s32.totalorder %s564_s15, %s565_s16  ;;  %s570_s24 = scalar_lea.hbm %s941_s2, 48 }
  0x1a   : > { %p571_p4 = scmp.lt.s32.totalorder %s564_s15, %s941_s2  ;;  %p572_p6 = scmp.lt.s32.totalorder %s570_s24, %s565_s16 }
  0x1b   : > { %p568_p1 = pnand %p567_p0, %p566_p13 }
  0x1c   : > { %p573_p7 = por %p572_p6, %p571_p4 }
  0x1d   : > { %p569_p2 = pneg %p568_p1 }
  0x1f   : > { %p574_p9 = pnand %p573_p7, %p569_p2 }
  0x21   : > { %577 = shalt.err (!%p574_p9)
}
  0x22   : > { %514 = dma.hbm_to_vmem [thread:$0]  (!%p822_p10), %s189_s10, 256, %s191_s12, %s828_s14  }
  0x23   : > { %p849_p13 = por %p944_p11, %p84_p3  ;;  %p147_p1 = scmp.lt.s32.totalorder %s723_s20, 4 }
  0x24   : > { %s951_s1 = sld [smem:[#allocation13_spill]]  ;;  %s206_s16 = scalar_lea.hbm %s942_s3, %s495_s6 }
  0x25   : > { %p862_p2 = pnand %p476_p12, %p147_p1  ;;  %s725_s10 = smov [#allocation3]  }
  0x26   : > { %s163_s12 = sshll.u32 %s725_s10, 4  ;;  %s208_s23 = sshll.u32 %s206_s16, 4  ;;  %s164_s12 = int_to_ptr.vmem [resolvable:$true] %s163_s12  ;;  %s209_s23 = int_to_ptr.hbm [resolvable:$true] %s208_s23 }
  0x27   : > { %p507_p3 = pneg %p862_p2  ;;  %s201_s24 = scalar_lea.vmem [#allocation8], %s813_s5 }
  0x28   : > { %s210_s27 = sshll.u32 %s201_s24, 4  ;;  %s726_s6 = smov 128   ;;  %s211_s27 = int_to_ptr.vmem [resolvable:$true] %s210_s27 }
  0x29   : > { %p508_p4 = pnand %p507_p3, %p944_p11  ;;  %s727_s30 = smov 8  }
  0x2a   : > { %s161_s9 = sshll.u32 %s951_s1, 4  ;;  %s623_s7 = sshra.s32 %s209_s23, 4  ;;  %s162_s9 = int_to_ptr.hbm [resolvable:$true] %s161_s9  ;;  %s624_s7 = int_to_ptr.hbm [resolvable:$true] %s623_s7 }
  0x2b   : > { %510 = dma.hbm_to_vmem [thread:$0]  (!%p508_p4), %s162_s9, 4096, %s164_s12, [#allocation4], %s726_s6, %s726_s6, %s727_s30  }
  0x2c   : > { %s625_s8 = scalar_lea.hbm %s624_s7, 16  ;;  %s630_s16 = scalar_lea.hbm %s942_s3, 48 }
  0x2d   : > { %p626_p12 = scmp.ne.s32.totalorder %s624_s7, %s625_s8  ;;  %p631_p9 = scmp.lt.s32.totalorder %s624_s7, %s942_s3 }
  0x2e   : > { %p632_p1 = scmp.lt.s32.totalorder %s630_s16, %s625_s8 }
  0x2f   : > { %p628_p6 = pnand %p626_p12, %p567_p0 }
  0x30   : > { %p633_p3 = por %p632_p1, %p631_p9 }
  0x31   : > { %p629_p7 = pneg %p628_p6 }
  0x33   : > { %p634_p11 = pnand %p633_p3, %p629_p7 }
  0x35   : > { %637 = shalt.err (!%p634_p11)
}
  0x36   : > { %517 = dma.hbm_to_vmem [thread:$0]  (!%p822_p10), %s209_s23, 256, %s211_s27, %s828_s14  }
  0x37   : > { %219 = sbr.rel (%p862_p2) target bundleno = 244 (0xf4), region = 36  ;;  %p953_p0 = scmp.eq.s32.totalorder (!%p862_p2), %s777_s0, 0 }
  0x3c   : > { %698 = dma.done.wait (%p953_p0), [#allocation4], 4096   ;;  %p954_p4 = pmov %p953_p0 }
  0x3d   : > { %s226_s1 = sand.u32 1, %s777_s0   ;;  %s891_s5 = sand.u32 1, %s715_s18  }
  0x3e   : > { %700 = vsyncadd (%p954_p4), [#allocation4], 4294963200  ;;  %s487_s13 = sshll.u32 %s891_s5, 4  ;;  %s227_s9 = scalar_lea.sflag [#allocation7], %s226_s1 }
  0x3f   : > { %s896_s14 = scalar_lea.vmem [#allocation6], %s487_s13 }
  0x40   : > { %702 = dma.done.wait (%p849_p13), %s227_s9, 512  }
  0x41   : > { %704 = vsyncadd (%p849_p13), %s227_s9, 4294966784  ;;  %v293_v0 = vld [vmem:[#allocation3 + $0x78] sm:$0xff]  ;;  %v292_v2 = vld [vmem:[#allocation3 + $0x70] sm:$0xff]  ;;  %s240_s29 = scalar_lea.vmem [#allocation8], %s487_s13  ;;  %s271_s21 = sld [smem:[#allocation2]] }
  0x42   : > { %v309_v1 = vld [vmem:[#allocation3 + $0xf8] sm:$0xff]  ;;  %310 = vmatpush.msra.mxu0 %v293_v0  ;;  %v308_v3 = vld [vmem:[#allocation3 + $0xf0] sm:$0xff]  ;;  %v291_v4 = vld [vmem:[#allocation3 + $0x68] sm:$0xff]  ;;  %s489_s12 = sshll.u32 %s891_s5, 3  ;;  %s492_s23 = sshll.u32 %s777_s0, 3 }
  0x43   : > { %330 = vmatpush.msra.mxu1 %v309_v1  ;;  %v307_v5 = vld [vmem:[#allocation3 + $0xe8] sm:$0xff]  ;;  %v290_v6 = vld [vmem:[#allocation3 + $0x60] sm:$0xff]  ;;  %v289_v8 = vld [vmem:[#allocation3 + $0x58] sm:$0xff]  ;;  %s368_s6 = scalar_lea.hbm %s943_s4, %s492_s23  ;;  %s270_s30 = scalar_lea.vmem [#allocation9], %s489_s12 }
  0x44   : > { %311 = vmatpush.msra.mxu0 %v292_v2  ;;  %v306_v7 = vld [vmem:[#allocation3 + $0xe0] sm:$0xff]  ;;  %v305_v9 = vld [vmem:[#allocation3 + $0xd8] sm:$0xff]  ;;  %v288_v10 = vld [vmem:[#allocation3 + $0x50] sm:$0xff]  ;;  %s370_s7 = sshll.u32 %s270_s30, 4  ;;  %s372_s8 = sshll.u32 %s368_s6, 4  ;;  %s371_s7 = int_to_ptr.vmem [resolvable:$true] %s370_s7  ;;  %s373_s8 = int_to_ptr.hbm [resolvable:$true] %s372_s8 }
  0x45   : > { %331 = vmatpush.msra.mxu1 %v308_v3  ;;  %v304_v11 = vld [vmem:[#allocation3 + $0xd0] sm:$0xff]  ;;  %v287_v12 = vld [vmem:[#allocation3 + $0x48] sm:$0xff]  ;;  %v286_v14 = vld [vmem:[#allocation3 + $0x40] sm:$0xff]  ;;  %s358_s11 = scalar_lea.sflag [#allocation5], %s891_s5  ;;  %s667_s15 = sshra.s32 %s373_s8, 4  ;;  %s668_s15 = int_to_ptr.hbm [resolvable:$true] %s667_s15 }
  0x46   : > { %312 = vmatpush.msra.mxu0 %v291_v4  ;;  %v303_v13 = vld [vmem:[#allocation3 + $0xc8] sm:$0xff]  ;;  %v302_v15 = vld [vmem:[#allocation3 + $0xc0] sm:$0xff]  ;;  %v285_v16 = vld [vmem:[#allocation3 + $0x38] sm:$0xff]  ;;  %s669_s16 = scalar_lea.hbm %s668_s15, 8  ;;  %s673_s1 = scalar_lea.hbm %s943_s4, 24 }
  0x47   : > { %332 = vmatpush.msra.mxu1 %v307_v5  ;;  %v301_v17 = vld [vmem:[#allocation3 + $0xb8] sm:$0xff]  ;;  %v284_v18 = vld [vmem:[#allocation3 + $0x30] sm:$0xff]  ;;  %v283_v20 = vld [vmem:[#allocation3 + $0x28] sm:$0xff]  ;;  %v351_v41 = vstv %s271_s21  ;;  %p670_p10 = scmp.ne.s32.totalorder %s668_s15, %s669_s16  ;;  %p674_p2 = scmp.lt.s32.totalorder %s668_s15, %s943_s4 }
  0x48   : > { %313 = vmatpush.msra.mxu0 %v290_v6  ;;  %v300_v19 = vld [vmem:[#allocation3 + $0xb0] sm:$0xff]  ;;  %v299_v21 = vld [vmem:[#allocation3 + $0xa8] sm:$0xff]  ;;  %v282_v22 = vld [vmem:[#allocation3 + $0x20] sm:$0xff]  ;;  %p675_p12 = scmp.lt.s32.totalorder %s673_s1, %s669_s16 }
  0x49   : > { %333 = vmatpush.msra.mxu1 %v306_v7  ;;  %v298_v23 = vld [vmem:[#allocation3 + $0xa0] sm:$0xff]  ;;  %v281_v24 = vld [vmem:[#allocation3 + $0x18] sm:$0xff]  ;;  %v280_v26 = vld [vmem:[#allocation3 + $0x10] sm:$0xff]  ;;  %p671_p11 = pnand %p670_p10, %p795_p5 }
  0x4a   : > { %314 = vmatpush.msra.mxu0 %v289_v8  ;;  %v297_v25 = vld [vmem:[#allocation3 + $0x98] sm:$0xff]  ;;  %v296_v27 = vld [vmem:[#allocation3 + $0x90] sm:$0xff]  ;;  %v279_v32 = vld [vmem:[#allocation3 + $0x8] sm:$0xff]  ;;  %p676_p6 = por %p675_p12, %p674_p2 }
  0x4b   : > { %334 = vmatpush.msra.mxu1 %v305_v9  ;;  %v272_v28 = vld [vmem:[%s896_s14] sm:$0xff]  ;;  %v273_v30 = vld [vmem:[%s896_s14 + $0x8] sm:$0xff]  ;;  %p672_p13 = pneg %p671_p11 }
  0x4c   : > { %315 = vmatpush.msra.mxu0 %v288_v10  ;;  %v274_v29 = vld [vmem:[%s240_s29] sm:$0xff]  ;;  %v275_v31 = vld [vmem:[%s240_s29 + $0x8] sm:$0xff] }
  0x4d   : > { %335 = vmatpush.msra.mxu1 %v304_v11  ;;  %v295_v33 = vld [vmem:[#allocation3 + $0x88] sm:$0xff]  ;;  %v278_v34 = vld [vmem:[#allocation3] sm:$0xff]  ;;  %v276_v36 = vmul.f32 %v274_v29, %v272_v28  ;;  %v277_v37 = vmul.f32 %v275_v31, %v273_v30  ;;  %p677_p7 = pnand %p676_p6, %p672_p13 }
  0x4e   : > { %316 = vmatpush.msra.mxu0 %v287_v12  ;;  %v294_v35 = vld [vmem:[#allocation3 + $0x80] sm:$0xff] }
  0x4f   : > { %336 = vmatpush.msra.mxu1 %v303_v13 }
  0x50   : > { %317 = vmatpush.msra.mxu0 %v286_v14 }
  0x51   : > { %337 = vmatpush.msra.mxu1 %v302_v15 }
  0x52   : > { %318 = vmatpush.msra.mxu0 %v285_v16 }
  0x53   : > { %338 = vmatpush.msra.mxu1 %v301_v17 }
  0x54   : > { %319 = vmatpush.msra.mxu0 %v284_v18 }
  0x55   : > { %339 = vmatpush.msra.mxu1 %v300_v19 }
  0x56   : > { %320 = vmatpush.msra.mxu0 %v283_v20 }
  0x57   : > { %340 = vmatpush.msra.mxu1 %v299_v21 }
  0x58   : > { %321 = vmatpush.msra.mxu0 %v282_v22 }
  0x59   : > { %341 = vmatpush.msra.mxu1 %v298_v23 }
  0x5a   : > { %322 = vmatpush.msra.mxu0 %v281_v24 }
  0x5b   : > { %342 = vmatpush.msra.mxu1 %v297_v25 }
  0x5c   : > { %323 = vmatpush.msra.mxu0 %v280_v26 }
  0x5d   : > { %343 = vmatpush.msra.mxu1 %v296_v27 }
  0x5e   : > { %324 = vmatpush.msra.mxu0 %v279_v32 }
  0x5f   : > { %344 = vmatpush.msra.mxu1 %v295_v33 }
  0x60   : > { %325 = vmatpush.msra.mxu0 %v278_v34 }
  0x61   : > { %345 = vmatpush.msra.mxu1 %v294_v35  ;;  %326 = vmatmul.f32.vlgmr.msra.gmra.mxu0 %v276_v36 }
  0x62   : > { %346 = vmatmul.f32.vlgmr.msra.gmra.mxu1 %v277_v37 }
  0xde   : > { %v327_v38 = vpop.f32.mrf.mxu0 }
  0xdf   : > { %v347_v39 = vpop.f32.mrf.mxu1 }
  0xe0   : > { %v348_v40 = vadd.f32 %v347_v39, %v327_v38 }
  0xe2   : > { %v490_v42 = vadd.f32 -1.0, %v348_v40 }
  0xe4   : > { %v352_v43 = vmul.f32 %v490_v42, %v351_v41 }
  0xe6   : > { %v353_v44 = vmul.f32 1.442695, %v352_v43 }
  0xe8   : > { %561 = vpow2.f32 %v353_v44 }
  0xee   : > { %v562_v45 = vpop.eup %561 }
  0xef   : > { %v355_v46 = vsub.f32 1.0, %v562_v45 }
  0xf1   : > { %356 = vst [vmem:[%s270_s30] sm:$0xff] %v355_v46 }
  0xf2   : > { %680 = shalt.err (!%p677_p7)
}
  0xf3   : > { %505 = dma.vmem_to_hbm [thread:$0]  (%p795_p5), %s371_s7, 128, %s373_s8, %s358_s11  }
  0xf4 PF: > { %p525_p9 = scmp.ge.s32.totalorder %s723_s20, 2  ;;  %s384_s5 = sand.u32 1, %s711_s17  }
  0xf5   : > { %s385_s14 = scalar_lea.sflag [#allocation5], %s384_s5 }
  0xf6   : > { %p519_p1 = pnand %p525_p9, %p806_p8 }
  0xf8   : > { %p520_p3 = pneg %p519_p1 }
  0xfa   : > { %706 = dma.done.wait (%p520_p3), %s385_s14, 128  }
  0xfb   : > { %708 = vsyncadd (%p520_p3), %s385_s14, 4294967168  ;;  %p19_p0 = scmp.ge.s32.totalorder %s781_s22, 5   ;;  %s955_s17 = smov %s715_s18 }
  0xfc   : > { %s956_s18 = smov %s719_s19  ;;  %s957_s19 = smov %s793_s25 }
  0xfd   : > { %s958_s20 = smov %s781_s22  ;;  %21 = sbr.rel (!%p19_p0) target bundleno = 9 (0x9), region = 97 }
 0x102   :  { %391 = vsyncpa [#allocation4], 1 }
 0x103   :  { %393 = vsyncpa [#allocation4 + $0x1], 1 }
 0x104   :  { %394 = vsyncpa [#allocation7], 1 }
 0x105   :  { %396 = vsyncpa [#allocation7 + $0x1], 1 }
 0x106   :  { %397 = vsyncpa [#allocation5], 1 }
 0x107   :  { %399 = vsyncpa [#allocation5 + $0x1], 1 }

</bundles_post_ra>
